<compile_context>
chip_gen: v7x
topology: tpu7x:2x2x1
jax: 0.10.0
libtpu: 0.0.40
codegen_flags: <defaults>
</compile_context>

<pallas_src>
import functools
import math

import jax
import jax.numpy as jnp
from jax.experimental import pallas as pl
from jax.experimental.pallas import tpu as pltpu


def _embedding_gather_kernel(ids_ref, lut_hbm, out_ref, sem, *,
                             block, g, scale, n_token):
    # ids_ref : (N_pad,) int32 token ids in SMEM (scalar prefetch)
    # lut_hbm : (n_token, d_model) embedding table, left in HBM (pl.ANY)
    # out_ref : (block, d_model) output tile in VMEM (direct DMA destination)
    # sem     : (1,) DMA semaphore shared by every row copy of this block
    i = pl.program_id(0)
    base = i * block

    def issue_row(r):
        tok = ids_ref[base + r]
        # Clamp so the DMA stays in-bounds even for bad ids
        # (nn.Embedding would raise; documented behaviour difference).
        tok = jnp.minimum(jnp.maximum(tok, 0), n_token - 1)
        pltpu.make_async_copy(lut_hbm.at[tok], out_ref.at[r], sem.at[0]).start()

    # Issue every row copy of the block *before* waiting on any of them, so
    # the whole block's bytes are in flight at once (DMA-latency bound regime).
    nwaves = block // g
    rem = block - nwaves * g

    if nwaves > 0:
        @pl.loop(0, nwaves)
        def _(w):
            r0 = w * g
            for j in range(g):            # g DMA issues unrolled per wave
                issue_row(r0 + j)

    for j in range(rem):                  # static remainder (block % g) rows
        issue_row(nwaves * g + j)

    # Single bulk wait for all row copies: DMA semaphores count bytes, and the
    # sum signalled by the row copies equals the size of the output tile.
    pltpu.make_async_copy(out_ref, out_ref, sem.at[0]).wait()

    # Fused * sqrt(d_model), in place (free filler under the DMA-bound regime).
    out_ref[...] = (out_ref[...].astype(jnp.float32) * scale).astype(out_ref.dtype)


def _pick_block(n_total, block_tokens):
    """Pick the row-tile size.  Prefer a divisor of N (no padded tail, so the
    wrapper slice is a no-op); fall back to padding otherwise."""
    block_tokens = max(8, (block_tokens // 8) * 8)
    if n_total <= block_tokens:
        return n_total, False             # single block == full array dims
    lo = max(8, block_tokens // 4)
    for b in range(block_tokens, lo - 1, -8):   # multiples of 8, descending
        if n_total % b == 0:
            return b, False
    return block_tokens, True


def embeddings_forward(x, lut, *, block_tokens=512, gather_group=32):
    """x: (...,) int token ids; lut: (n_token, d_model). Returns (..., d_model)."""
    orig_shape = x.shape
    n_token, d_model = lut.shape
    scale = math.sqrt(d_model)
    itemsize = jnp.dtype(lut.dtype).itemsize

    N = int(x.size)
    if N == 0:
        return jnp.zeros(orig_shape + (d_model,), dtype=lut.dtype)

    ids = x.reshape(-1).astype(jnp.int32)

    # Keep the (auto double-buffered) output tile comfortably inside VMEM on
    # every generation (v7x: 64 MiB physical / 32 MiB default scoped limit).
    vmem_cap_rows = max(8, (8 * 1024 * 1024) // (2 * d_model * itemsize))
    block, needs_pad = _pick_block(N, min(block_tokens, vmem_cap_rows))

    if needs_pad:
        n_pad = ((N + block - 1) // block) * block
        ids = jnp.pad(ids, (0, n_pad - N))        # padded ids -> row 0, sliced off
    else:
        n_pad = N

    g = max(1, min(gather_group, block))
    grid = (n_pad // block,)

    out = pl.pallas_call(
        functools.partial(_embedding_gather_kernel,
                          block=block, g=g, scale=scale, n_token=n_token),
        out_shape=jax.ShapeDtypeStruct((n_pad, d_model), lut.dtype),
        grid_spec=pltpu.PrefetchScalarGridSpec(
            num_scalar_prefetch=1,                      # ids -> SMEM
            grid=grid,
            in_specs=[pl.BlockSpec(memory_space=pl.ANY)],   # table stays in HBM
            out_specs=pl.BlockSpec((block, d_model), lambda i, ids_s: (i, 0)),
            scratch_shapes=[pltpu.SemaphoreType.DMA((1,))],
        ),
        compiler_params=pltpu.CompilerParams(
            dimension_semantics=("parallel",)),
        cost_estimate=pl.CostEstimate(
            flops=int(n_pad) * int(d_model),
            transcendentals=0,
            bytes_accessed=2 * int(n_pad) * int(d_model) * int(itemsize)
                           + 4 * int(n_pad)),
    )(ids, lut)

    if n_pad != N:
        out = out[:N]                               # no-op when block divides N
    return out.reshape(*orig_shape, d_model)


if __name__ == "__main__":
    # Small, deterministic setup consistent with the module's __init__.
    n_token = 64
    d_model = 32
    B, S = 2, 8

    key = jax.random.PRNGKey(0)
    k_lut, k_ids = jax.random.split(key)

    # nn.Embedding default init is N(0, 1).
    lut = jax.random.normal(k_lut, (n_token, d_model), dtype=jnp.float32)
    x = jax.random.randint(k_ids, (B, S), 0, n_token, dtype=jnp.int32)

    out = jax.block_until_ready(embeddings_forward(x, lut))
    ref = jnp.take(lut, x, axis=0) * math.sqrt(d_model)
    assert out.shape == (B, S, d_model)
    assert jnp.allclose(out, ref, atol=1e-5, rtol=1e-5)

    # Single full-array block with a remainder issue-wave (N=400, g=32).
    x2 = jax.random.randint(jax.random.PRNGKey(1), (2, 200), 0, n_token, dtype=jnp.int32)
    out2 = jax.block_until_ready(embeddings_forward(x2, lut))
    ref2 = jnp.take(lut, x2, axis=0) * math.sqrt(d_model)
    assert out2.shape == (2, 200, d_model)
    assert jnp.allclose(out2, ref2, atol=1e-5, rtol=1e-5)

    # Multi-block grid with a padded tail (N=771 -> block=512, N_pad=1024).
    x3 = jax.random.randint(jax.random.PRNGKey(2), (3, 257), 0, n_token, dtype=jnp.int32)
    out3 = jax.block_until_ready(embeddings_forward(x3, lut))
    ref3 = jnp.take(lut, x3, axis=0) * math.sqrt(d_model)
    assert out3.shape == (3, 257, d_model)
    assert jnp.allclose(out3, ref3, atol=1e-5, rtol=1e-5)

    print("KERNEL_OK")
</pallas_src>

<mosaic_0001>
module attributes {stable_mosaic.version = 11 : i64} {
  func.func @_embedding_gather_kernel(%arg0: i32, %arg1: memref<16xi32, #tpu.memory_space<smem>>, %arg2: memref<64x32xf32, #tpu.memory_space<any>>, %arg3: memref<16x32xf32, #tpu.memory_space<vmem>>, %arg4: memref<1x!tpu.dma_semaphore, #tpu.memory_space<semaphore_mem>>) attributes {dimension_semantics = [#tpu.dimension_semantics<parallel>], iteration_bounds = array<i64: 1>, scalar_prefetch = 1 : i64, scratch_operands = 1 : i64, tpu.core_type = #tpu.core_type<tc>, window_params = [{}, {transform_indices = @transform_1, window_bounds = array<i64: 16, 32>}]} {
    %c16_i32 = arith.constant 16 : i32
    %0 = arith.muli %arg0, %c16_i32 : i32
    %c0_i32 = arith.constant 0 : i32
    %c1_i32 = arith.constant 1 : i32
    %1 = arith.muli %c0_i32, %c1_i32 : i32
    %c0_i32_0 = arith.constant 0 : i32
    %2 = arith.addi %c0_i32_0, %1 : i32
    %c16_i32_1 = arith.constant 16 : i32
    %3 = arith.muli %2, %c16_i32_1 : i32
    %c0_i32_2 = arith.constant 0 : i32
    %4 = arith.addi %3, %c0_i32_2 : i32
    %5 = arith.addi %0, %4 : i32
    %6 = arith.index_cast %5 : i32 to index
    %7 = memref.load %arg1[%6] : memref<16xi32, #tpu.memory_space<smem>>
    %c0_i32_3 = arith.constant 0 : i32
    %8 = arith.maxsi %7, %c0_i32_3 : i32
    %c63_i32 = arith.constant 63 : i32
    %9 = arith.minsi %8, %c63_i32 : i32
    %c0_i32_4 = arith.constant 0 : i32
    %c0_i32_5 = arith.constant 0 : i32
    %10 = tpu.memref_slice %arg2[%9, %c0_i32_5] : memref<64x32xf32, #tpu.memory_space<any>> -> memref<1x32xf32, #tpu.memory_space<any>>
    %11 = tpu.memref_squeeze %10 : memref<1x32xf32, #tpu.memory_space<any>> -> memref<32xf32, #tpu.memory_space<any>>
    %c0_i32_6 = arith.constant 0 : i32
    %12 = tpu.memref_slice %arg3[%4, %c0_i32_6] : memref<16x32xf32, #tpu.memory_space<vmem>> -> memref<1x32xf32, #tpu.memory_space<vmem>>
    %13 = tpu.memref_squeeze %12 : memref<1x32xf32, #tpu.memory_space<vmem>> -> memref<32xf32, #tpu.memory_space<vmem>>
    %14 = tpu.memref_slice %arg4[%c0_i32_4] : memref<1x!tpu.dma_semaphore, #tpu.memory_space<semaphore_mem>> -> memref<1x!tpu.dma_semaphore, #tpu.memory_space<semaphore_mem>>
    %15 = tpu.memref_squeeze %14 : memref<1x!tpu.dma_semaphore, #tpu.memory_space<semaphore_mem>> -> memref<!tpu.dma_semaphore, #tpu.memory_space<semaphore_mem>>
    tpu.enqueue_dma source(%11 : memref<32xf32, #tpu.memory_space<any>>) target(%13 : memref<32xf32, #tpu.memory_space<vmem>>) target_semaphore(%15 : memref<!tpu.dma_semaphore, #tpu.memory_space<semaphore_mem>>)
    %c1_i32_7 = arith.constant 1 : i32
    %16 = arith.addi %3, %c1_i32_7 : i32
    %17 = arith.addi %0, %16 : i32
    %18 = arith.index_cast %17 : i32 to index
    %19 = memref.load %arg1[%18] : memref<16xi32, #tpu.memory_space<smem>>
    %c0_i32_8 = arith.constant 0 : i32
    %20 = arith.maxsi %19, %c0_i32_8 : i32
    %c63_i32_9 = arith.constant 63 : i32
    %21 = arith.minsi %20, %c63_i32_9 : i32
    %c0_i32_10 = arith.constant 0 : i32
    %c0_i32_11 = arith.constant 0 : i32
    %22 = tpu.memref_slice %arg2[%21, %c0_i32_11] : memref<64x32xf32, #tpu.memory_space<any>> -> memref<1x32xf32, #tpu.memory_space<any>>
    %23 = tpu.memref_squeeze %22 : memref<1x32xf32, #tpu.memory_space<any>> -> memref<32xf32, #tpu.memory_space<any>>
    %c0_i32_12 = arith.constant 0 : i32
    %24 = tpu.memref_slice %arg3[%16, %c0_i32_12] : memref<16x32xf32, #tpu.memory_space<vmem>> -> memref<1x32xf32, #tpu.memory_space<vmem>>
    %25 = tpu.memref_squeeze %24 : memref<1x32xf32, #tpu.memory_space<vmem>> -> memref<32xf32, #tpu.memory_space<vmem>>
    %26 = tpu.memref_slice %arg4[%c0_i32_10] : memref<1x!tpu.dma_semaphore, #tpu.memory_space<semaphore_mem>> -> memref<1x!tpu.dma_semaphore, #tpu.memory_space<semaphore_mem>>
    %27 = tpu.memref_squeeze %26 : memref<1x!tpu.dma_semaphore, #tpu.memory_space<semaphore_mem>> -> memref<!tpu.dma_semaphore, #tpu.memory_space<semaphore_mem>>
    tpu.enqueue_dma source(%23 : memref<32xf32, #tpu.memory_space<any>>) target(%25 : memref<32xf32, #tpu.memory_space<vmem>>) target_semaphore(%27 : memref<!tpu.dma_semaphore, #tpu.memory_space<semaphore_mem>>)
    %c2_i32 = arith.constant 2 : i32
    %28 = arith.addi %3, %c2_i32 : i32
    %29 = arith.addi %0, %28 : i32
    %30 = arith.index_cast %29 : i32 to index
    %31 = memref.load %arg1[%30] : memref<16xi32, #tpu.memory_space<smem>>
    %c0_i32_13 = arith.constant 0 : i32
    %32 = arith.maxsi %31, %c0_i32_13 : i32
    %c63_i32_14 = arith.constant 63 : i32
    %33 = arith.minsi %32, %c63_i32_14 : i32
    %c0_i32_15 = arith.constant 0 : i32
    %c0_i32_16 = arith.constant 0 : i32
    %34 = tpu.memref_slice %arg2[%33, %c0_i32_16] : memref<64x32xf32, #tpu.memory_space<any>> -> memref<1x32xf32, #tpu.memory_space<any>>
    %35 = tpu.memref_squeeze %34 : memref<1x32xf32, #tpu.memory_space<any>> -> memref<32xf32, #tpu.memory_space<any>>
    %c0_i32_17 = arith.constant 0 : i32
    %36 = tpu.memref_slice %arg3[%28, %c0_i32_17] : memref<16x32xf32, #tpu.memory_space<vmem>> -> memref<1x32xf32, #tpu.memory_space<vmem>>
    %37 = tpu.memref_squeeze %36 : memref<1x32xf32, #tpu.memory_space<vmem>> -> memref<32xf32, #tpu.memory_space<vmem>>
    %38 = tpu.memref_slice %arg4[%c0_i32_15] : memref<1x!tpu.dma_semaphore, #tpu.memory_space<semaphore_mem>> -> memref<1x!tpu.dma_semaphore, #tpu.memory_space<semaphore_mem>>
    %39 = tpu.memref_squeeze %38 : memref<1x!tpu.dma_semaphore, #tpu.memory_space<semaphore_mem>> -> memref<!tpu.dma_semaphore, #tpu.memory_space<semaphore_mem>>
    tpu.enqueue_dma source(%35 : memref<32xf32, #tpu.memory_space<any>>) target(%37 : memref<32xf32, #tpu.memory_space<vmem>>) target_semaphore(%39 : memref<!tpu.dma_semaphore, #tpu.memory_space<semaphore_mem>>)
    %c3_i32 = arith.constant 3 : i32
    %40 = arith.addi %3, %c3_i32 : i32
    %41 = arith.addi %0, %40 : i32
    %42 = arith.index_cast %41 : i32 to index
    %43 = memref.load %arg1[%42] : memref<16xi32, #tpu.memory_space<smem>>
    %c0_i32_18 = arith.constant 0 : i32
    %44 = arith.maxsi %43, %c0_i32_18 : i32
    %c63_i32_19 = arith.constant 63 : i32
    %45 = arith.minsi %44, %c63_i32_19 : i32
    %c0_i32_20 = arith.constant 0 : i32
    %c0_i32_21 = arith.constant 0 : i32
    %46 = tpu.memref_slice %arg2[%45, %c0_i32_21] : memref<64x32xf32, #tpu.memory_space<any>> -> memref<1x32xf32, #tpu.memory_space<any>>
    %47 = tpu.memref_squeeze %46 : memref<1x32xf32, #tpu.memory_space<any>> -> memref<32xf32, #tpu.memory_space<any>>
    %c0_i32_22 = arith.constant 0 : i32
    %48 = tpu.memref_slice %arg3[%40, %c0_i32_22] : memref<16x32xf32, #tpu.memory_space<vmem>> -> memref<1x32xf32, #tpu.memory_space<vmem>>
    %49 = tpu.memref_squeeze %48 : memref<1x32xf32, #tpu.memory_space<vmem>> -> memref<32xf32, #tpu.memory_space<vmem>>
    %50 = tpu.memref_slice %arg4[%c0_i32_20] : memref<1x!tpu.dma_semaphore, #tpu.memory_space<semaphore_mem>> -> memref<1x!tpu.dma_semaphore, #tpu.memory_space<semaphore_mem>>
    %51 = tpu.memref_squeeze %50 : memref<1x!tpu.dma_semaphore, #tpu.memory_space<semaphore_mem>> -> memref<!tpu.dma_semaphore, #tpu.memory_space<semaphore_mem>>
    tpu.enqueue_dma source(%47 : memref<32xf32, #tpu.memory_space<any>>) target(%49 : memref<32xf32, #tpu.memory_space<vmem>>) target_semaphore(%51 : memref<!tpu.dma_semaphore, #tpu.memory_space<semaphore_mem>>)
    %c4_i32 = arith.constant 4 : i32
    %52 = arith.addi %3, %c4_i32 : i32
    %53 = arith.addi %0, %52 : i32
    %54 = arith.index_cast %53 : i32 to index
    %55 = memref.load %arg1[%54] : memref<16xi32, #tpu.memory_space<smem>>
    %c0_i32_23 = arith.constant 0 : i32
    %56 = arith.maxsi %55, %c0_i32_23 : i32
    %c63_i32_24 = arith.constant 63 : i32
    %57 = arith.minsi %56, %c63_i32_24 : i32
    %c0_i32_25 = arith.constant 0 : i32
    %c0_i32_26 = arith.constant 0 : i32
    %58 = tpu.memref_slice %arg2[%57, %c0_i32_26] : memref<64x32xf32, #tpu.memory_space<any>> -> memref<1x32xf32, #tpu.memory_space<any>>
    %59 = tpu.memref_squeeze %58 : memref<1x32xf32, #tpu.memory_space<any>> -> memref<32xf32, #tpu.memory_space<any>>
    %c0_i32_27 = arith.constant 0 : i32
    %60 = tpu.memref_slice %arg3[%52, %c0_i32_27] : memref<16x32xf32, #tpu.memory_space<vmem>> -> memref<1x32xf32, #tpu.memory_space<vmem>>
    %61 = tpu.memref_squeeze %60 : memref<1x32xf32, #tpu.memory_space<vmem>> -> memref<32xf32, #tpu.memory_space<vmem>>
    %62 = tpu.memref_slice %arg4[%c0_i32_25] : memref<1x!tpu.dma_semaphore, #tpu.memory_space<semaphore_mem>> -> memref<1x!tpu.dma_semaphore, #tpu.memory_space<semaphore_mem>>
    %63 = tpu.memref_squeeze %62 : memref<1x!tpu.dma_semaphore, #tpu.memory_space<semaphore_mem>> -> memref<!tpu.dma_semaphore, #tpu.memory_space<semaphore_mem>>
    tpu.enqueue_dma source(%59 : memref<32xf32, #tpu.memory_space<any>>) target(%61 : memref<32xf32, #tpu.memory_space<vmem>>) target_semaphore(%63 : memref<!tpu.dma_semaphore, #tpu.memory_space<semaphore_mem>>)
    %c5_i32 = arith.constant 5 : i32
    %64 = arith.addi %3, %c5_i32 : i32
    %65 = arith.addi %0, %64 : i32
    %66 = arith.index_cast %65 : i32 to index
    %67 = memref.load %arg1[%66] : memref<16xi32, #tpu.memory_space<smem>>
    %c0_i32_28 = arith.constant 0 : i32
    %68 = arith.maxsi %67, %c0_i32_28 : i32
    %c63_i32_29 = arith.constant 63 : i32
    %69 = arith.minsi %68, %c63_i32_29 : i32
    %c0_i32_30 = arith.constant 0 : i32
    %c0_i32_31 = arith.constant 0 : i32
    %70 = tpu.memref_slice %arg2[%69, %c0_i32_31] : memref<64x32xf32, #tpu.memory_space<any>> -> memref<1x32xf32, #tpu.memory_space<any>>
    %71 = tpu.memref_squeeze %70 : memref<1x32xf32, #tpu.memory_space<any>> -> memref<32xf32, #tpu.memory_space<any>>
    %c0_i32_32 = arith.constant 0 : i32
    %72 = tpu.memref_slice %arg3[%64, %c0_i32_32] : memref<16x32xf32, #tpu.memory_space<vmem>> -> memref<1x32xf32, #tpu.memory_space<vmem>>
    %73 = tpu.memref_squeeze %72 : memref<1x32xf32, #tpu.memory_space<vmem>> -> memref<32xf32, #tpu.memory_space<vmem>>
    %74 = tpu.memref_slice %arg4[%c0_i32_30] : memref<1x!tpu.dma_semaphore, #tpu.memory_space<semaphore_mem>> -> memref<1x!tpu.dma_semaphore, #tpu.memory_space<semaphore_mem>>
    %75 = tpu.memref_squeeze %74 : memref<1x!tpu.dma_semaphore, #tpu.memory_space<semaphore_mem>> -> memref<!tpu.dma_semaphore, #tpu.memory_space<semaphore_mem>>
    tpu.enqueue_dma source(%71 : memref<32xf32, #tpu.memory_space<any>>) target(%73 : memref<32xf32, #tpu.memory_space<vmem>>) target_semaphore(%75 : memref<!tpu.dma_semaphore, #tpu.memory_space<semaphore_mem>>)
    %c6_i32 = arith.constant 6 : i32
    %76 = arith.addi %3, %c6_i32 : i32
    %77 = arith.addi %0, %76 : i32
    %78 = arith.index_cast %77 : i32 to index
    %79 = memref.load %arg1[%78] : memref<16xi32, #tpu.memory_space<smem>>
    %c0_i32_33 = arith.constant 0 : i32
    %80 = arith.maxsi %79, %c0_i32_33 : i32
    %c63_i32_34 = arith.constant 63 : i32
    %81 = arith.minsi %80, %c63_i32_34 : i32
    %c0_i32_35 = arith.constant 0 : i32
    %c0_i32_36 = arith.constant 0 : i32
    %82 = tpu.memref_slice %arg2[%81, %c0_i32_36] : memref<64x32xf32, #tpu.memory_space<any>> -> memref<1x32xf32, #tpu.memory_space<any>>
    %83 = tpu.memref_squeeze %82 : memref<1x32xf32, #tpu.memory_space<any>> -> memref<32xf32, #tpu.memory_space<any>>
    %c0_i32_37 = arith.constant 0 : i32
    %84 = tpu.memref_slice %arg3[%76, %c0_i32_37] : memref<16x32xf32, #tpu.memory_space<vmem>> -> memref<1x32xf32, #tpu.memory_space<vmem>>
    %85 = tpu.memref_squeeze %84 : memref<1x32xf32, #tpu.memory_space<vmem>> -> memref<32xf32, #tpu.memory_space<vmem>>
    %86 = tpu.memref_slice %arg4[%c0_i32_35] : memref<1x!tpu.dma_semaphore, #tpu.memory_space<semaphore_mem>> -> memref<1x!tpu.dma_semaphore, #tpu.memory_space<semaphore_mem>>
    %87 = tpu.memref_squeeze %86 : memref<1x!tpu.dma_semaphore, #tpu.memory_space<semaphore_mem>> -> memref<!tpu.dma_semaphore, #tpu.memory_space<semaphore_mem>>
    tpu.enqueue_dma source(%83 : memref<32xf32, #tpu.memory_space<any>>) target(%85 : memref<32xf32, #tpu.memory_space<vmem>>) target_semaphore(%87 : memref<!tpu.dma_semaphore, #tpu.memory_space<semaphore_mem>>)
    %c7_i32 = arith.constant 7 : i32
    %88 = arith.addi %3, %c7_i32 : i32
    %89 = arith.addi %0, %88 : i32
    %90 = arith.index_cast %89 : i32 to index
    %91 = memref.load %arg1[%90] : memref<16xi32, #tpu.memory_space<smem>>
    %c0_i32_38 = arith.constant 0 : i32
    %92 = arith.maxsi %91, %c0_i32_38 : i32
    %c63_i32_39 = arith.constant 63 : i32
    %93 = arith.minsi %92, %c63_i32_39 : i32
    %c0_i32_40 = arith.constant 0 : i32
    %c0_i32_41 = arith.constant 0 : i32
    %94 = tpu.memref_slice %arg2[%93, %c0_i32_41] : memref<64x32xf32, #tpu.memory_space<any>> -> memref<1x32xf32, #tpu.memory_space<any>>
    %95 = tpu.memref_squeeze %94 : memref<1x32xf32, #tpu.memory_space<any>> -> memref<32xf32, #tpu.memory_space<any>>
    %c0_i32_42 = arith.constant 0 : i32
    %96 = tpu.memref_slice %arg3[%88, %c0_i32_42] : memref<16x32xf32, #tpu.memory_space<vmem>> -> memref<1x32xf32, #tpu.memory_space<vmem>>
    %97 = tpu.memref_squeeze %96 : memref<1x32xf32, #tpu.memory_space<vmem>> -> memref<32xf32, #tpu.memory_space<vmem>>
    %98 = tpu.memref_slice %arg4[%c0_i32_40] : memref<1x!tpu.dma_semaphore, #tpu.memory_space<semaphore_mem>> -> memref<1x!tpu.dma_semaphore, #tpu.memory_space<semaphore_mem>>
    %99 = tpu.memref_squeeze %98 : memref<1x!tpu.dma_semaphore, #tpu.memory_space<semaphore_mem>> -> memref<!tpu.dma_semaphore, #tpu.memory_space<semaphore_mem>>
    tpu.enqueue_dma source(%95 : memref<32xf32, #tpu.memory_space<any>>) target(%97 : memref<32xf32, #tpu.memory_space<vmem>>) target_semaphore(%99 : memref<!tpu.dma_semaphore, #tpu.memory_space<semaphore_mem>>)
    %c8_i32 = arith.constant 8 : i32
    %100 = arith.addi %3, %c8_i32 : i32
    %101 = arith.addi %0, %100 : i32
    %102 = arith.index_cast %101 : i32 to index
    %103 = memref.load %arg1[%102] : memref<16xi32, #tpu.memory_space<smem>>
    %c0_i32_43 = arith.constant 0 : i32
    %104 = arith.maxsi %103, %c0_i32_43 : i32
    %c63_i32_44 = arith.constant 63 : i32
    %105 = arith.minsi %104, %c63_i32_44 : i32
    %c0_i32_45 = arith.constant 0 : i32
    %c0_i32_46 = arith.constant 0 : i32
    %106 = tpu.memref_slice %arg2[%105, %c0_i32_46] : memref<64x32xf32, #tpu.memory_space<any>> -> memref<1x32xf32, #tpu.memory_space<any>>
    %107 = tpu.memref_squeeze %106 : memref<1x32xf32, #tpu.memory_space<any>> -> memref<32xf32, #tpu.memory_space<any>>
    %c0_i32_47 = arith.constant 0 : i32
    %108 = tpu.memref_slice %arg3[%100, %c0_i32_47] : memref<16x32xf32, #tpu.memory_space<vmem>> -> memref<1x32xf32, #tpu.memory_space<vmem>>
    %109 = tpu.memref_squeeze %108 : memref<1x32xf32, #tpu.memory_space<vmem>> -> memref<32xf32, #tpu.memory_space<vmem>>
    %110 = tpu.memref_slice %arg4[%c0_i32_45] : memref<1x!tpu.dma_semaphore, #tpu.memory_space<semaphore_mem>> -> memref<1x!tpu.dma_semaphore, #tpu.memory_space<semaphore_mem>>
    %111 = tpu.memref_squeeze %110 : memref<1x!tpu.dma_semaphore, #tpu.memory_space<semaphore_mem>> -> memref<!tpu.dma_semaphore, #tpu.memory_space<semaphore_mem>>
    tpu.enqueue_dma source(%107 : memref<32xf32, #tpu.memory_space<any>>) target(%109 : memref<32xf32, #tpu.memory_space<vmem>>) target_semaphore(%111 : memref<!tpu.dma_semaphore, #tpu.memory_space<semaphore_mem>>)
    %c9_i32 = arith.constant 9 : i32
    %112 = arith.addi %3, %c9_i32 : i32
    %113 = arith.addi %0, %112 : i32
    %114 = arith.index_cast %113 : i32 to index
    %115 = memref.load %arg1[%114] : memref<16xi32, #tpu.memory_space<smem>>
    %c0_i32_48 = arith.constant 0 : i32
    %116 = arith.maxsi %115, %c0_i32_48 : i32
    %c63_i32_49 = arith.constant 63 : i32
    %117 = arith.minsi %116, %c63_i32_49 : i32
    %c0_i32_50 = arith.constant 0 : i32
    %c0_i32_51 = arith.constant 0 : i32
    %118 = tpu.memref_slice %arg2[%117, %c0_i32_51] : memref<64x32xf32, #tpu.memory_space<any>> -> memref<1x32xf32, #tpu.memory_space<any>>
    %119 = tpu.memref_squeeze %118 : memref<1x32xf32, #tpu.memory_space<any>> -> memref<32xf32, #tpu.memory_space<any>>
    %c0_i32_52 = arith.constant 0 : i32
    %120 = tpu.memref_slice %arg3[%112, %c0_i32_52] : memref<16x32xf32, #tpu.memory_space<vmem>> -> memref<1x32xf32, #tpu.memory_space<vmem>>
    %121 = tpu.memref_squeeze %120 : memref<1x32xf32, #tpu.memory_space<vmem>> -> memref<32xf32, #tpu.memory_space<vmem>>
    %122 = tpu.memref_slice %arg4[%c0_i32_50] : memref<1x!tpu.dma_semaphore, #tpu.memory_space<semaphore_mem>> -> memref<1x!tpu.dma_semaphore, #tpu.memory_space<semaphore_mem>>
    %123 = tpu.memref_squeeze %122 : memref<1x!tpu.dma_semaphore, #tpu.memory_space<semaphore_mem>> -> memref<!tpu.dma_semaphore, #tpu.memory_space<semaphore_mem>>
    tpu.enqueue_dma source(%119 : memref<32xf32, #tpu.memory_space<any>>) target(%121 : memref<32xf32, #tpu.memory_space<vmem>>) target_semaphore(%123 : memref<!tpu.dma_semaphore, #tpu.memory_space<semaphore_mem>>)
    %c10_i32 = arith.constant 10 : i32
    %124 = arith.addi %3, %c10_i32 : i32
    %125 = arith.addi %0, %124 : i32
    %126 = arith.index_cast %125 : i32 to index
    %127 = memref.load %arg1[%126] : memref<16xi32, #tpu.memory_space<smem>>
    %c0_i32_53 = arith.constant 0 : i32
    %128 = arith.maxsi %127, %c0_i32_53 : i32
    %c63_i32_54 = arith.constant 63 : i32
    %129 = arith.minsi %128, %c63_i32_54 : i32
    %c0_i32_55 = arith.constant 0 : i32
    %c0_i32_56 = arith.constant 0 : i32
    %130 = tpu.memref_slice %arg2[%129, %c0_i32_56] : memref<64x32xf32, #tpu.memory_space<any>> -> memref<1x32xf32, #tpu.memory_space<any>>
    %131 = tpu.memref_squeeze %130 : memref<1x32xf32, #tpu.memory_space<any>> -> memref<32xf32, #tpu.memory_space<any>>
    %c0_i32_57 = arith.constant 0 : i32
    %132 = tpu.memref_slice %arg3[%124, %c0_i32_57] : memref<16x32xf32, #tpu.memory_space<vmem>> -> memref<1x32xf32, #tpu.memory_space<vmem>>
    %133 = tpu.memref_squeeze %132 : memref<1x32xf32, #tpu.memory_space<vmem>> -> memref<32xf32, #tpu.memory_space<vmem>>
    %134 = tpu.memref_slice %arg4[%c0_i32_55] : memref<1x!tpu.dma_semaphore, #tpu.memory_space<semaphore_mem>> -> memref<1x!tpu.dma_semaphore, #tpu.memory_space<semaphore_mem>>
    %135 = tpu.memref_squeeze %134 : memref<1x!tpu.dma_semaphore, #tpu.memory_space<semaphore_mem>> -> memref<!tpu.dma_semaphore, #tpu.memory_space<semaphore_mem>>
    tpu.enqueue_dma source(%131 : memref<32xf32, #tpu.memory_space<any>>) target(%133 : memref<32xf32, #tpu.memory_space<vmem>>) target_semaphore(%135 : memref<!tpu.dma_semaphore, #tpu.memory_space<semaphore_mem>>)
    %c11_i32 = arith.constant 11 : i32
    %136 = arith.addi %3, %c11_i32 : i32
    %137 = arith.addi %0, %136 : i32
    %138 = arith.index_cast %137 : i32 to index
    %139 = memref.load %arg1[%138] : memref<16xi32, #tpu.memory_space<smem>>
    %c0_i32_58 = arith.constant 0 : i32
    %140 = arith.maxsi %139, %c0_i32_58 : i32
    %c63_i32_59 = arith.constant 63 : i32
    %141 = arith.minsi %140, %c63_i32_59 : i32
    %c0_i32_60 = arith.constant 0 : i32
    %c0_i32_61 = arith.constant 0 : i32
    %142 = tpu.memref_slice %arg2[%141, %c0_i32_61] : memref<64x32xf32, #tpu.memory_space<any>> -> memref<1x32xf32, #tpu.memory_space<any>>
    %143 = tpu.memref_squeeze %142 : memref<1x32xf32, #tpu.memory_space<any>> -> memref<32xf32, #tpu.memory_space<any>>
    %c0_i32_62 = arith.constant 0 : i32
    %144 = tpu.memref_slice %arg3[%136, %c0_i32_62] : memref<16x32xf32, #tpu.memory_space<vmem>> -> memref<1x32xf32, #tpu.memory_space<vmem>>
    %145 = tpu.memref_squeeze %144 : memref<1x32xf32, #tpu.memory_space<vmem>> -> memref<32xf32, #tpu.memory_space<vmem>>
    %146 = tpu.memref_slice %arg4[%c0_i32_60] : memref<1x!tpu.dma_semaphore, #tpu.memory_space<semaphore_mem>> -> memref<1x!tpu.dma_semaphore, #tpu.memory_space<semaphore_mem>>
    %147 = tpu.memref_squeeze %146 : memref<1x!tpu.dma_semaphore, #tpu.memory_space<semaphore_mem>> -> memref<!tpu.dma_semaphore, #tpu.memory_space<semaphore_mem>>
    tpu.enqueue_dma source(%143 : memref<32xf32, #tpu.memory_space<any>>) target(%145 : memref<32xf32, #tpu.memory_space<vmem>>) target_semaphore(%147 : memref<!tpu.dma_semaphore, #tpu.memory_space<semaphore_mem>>)
    %c12_i32 = arith.constant 12 : i32
    %148 = arith.addi %3, %c12_i32 : i32
    %149 = arith.addi %0, %148 : i32
    %150 = arith.index_cast %149 : i32 to index
    %151 = memref.load %arg1[%150] : memref<16xi32, #tpu.memory_space<smem>>
    %c0_i32_63 = arith.constant 0 : i32
    %152 = arith.maxsi %151, %c0_i32_63 : i32
    %c63_i32_64 = arith.constant 63 : i32
    %153 = arith.minsi %152, %c63_i32_64 : i32
    %c0_i32_65 = arith.constant 0 : i32
    %c0_i32_66 = arith.constant 0 : i32
    %154 = tpu.memref_slice %arg2[%153, %c0_i32_66] : memref<64x32xf32, #tpu.memory_space<any>> -> memref<1x32xf32, #tpu.memory_space<any>>
    %155 = tpu.memref_squeeze %154 : memref<1x32xf32, #tpu.memory_space<any>> -> memref<32xf32, #tpu.memory_space<any>>
    %c0_i32_67 = arith.constant 0 : i32
    %156 = tpu.memref_slice %arg3[%148, %c0_i32_67] : memref<16x32xf32, #tpu.memory_space<vmem>> -> memref<1x32xf32, #tpu.memory_space<vmem>>
    %157 = tpu.memref_squeeze %156 : memref<1x32xf32, #tpu.memory_space<vmem>> -> memref<32xf32, #tpu.memory_space<vmem>>
    %158 = tpu.memref_slice %arg4[%c0_i32_65] : memref<1x!tpu.dma_semaphore, #tpu.memory_space<semaphore_mem>> -> memref<1x!tpu.dma_semaphore, #tpu.memory_space<semaphore_mem>>
    %159 = tpu.memref_squeeze %158 : memref<1x!tpu.dma_semaphore, #tpu.memory_space<semaphore_mem>> -> memref<!tpu.dma_semaphore, #tpu.memory_space<semaphore_mem>>
    tpu.enqueue_dma source(%155 : memref<32xf32, #tpu.memory_space<any>>) target(%157 : memref<32xf32, #tpu.memory_space<vmem>>) target_semaphore(%159 : memref<!tpu.dma_semaphore, #tpu.memory_space<semaphore_mem>>)
    %c13_i32 = arith.constant 13 : i32
    %160 = arith.addi %3, %c13_i32 : i32
    %161 = arith.addi %0, %160 : i32
    %162 = arith.index_cast %161 : i32 to index
    %163 = memref.load %arg1[%162] : memref<16xi32, #tpu.memory_space<smem>>
    %c0_i32_68 = arith.constant 0 : i32
    %164 = arith.maxsi %163, %c0_i32_68 : i32
    %c63_i32_69 = arith.constant 63 : i32
    %165 = arith.minsi %164, %c63_i32_69 : i32
    %c0_i32_70 = arith.constant 0 : i32
    %c0_i32_71 = arith.constant 0 : i32
    %166 = tpu.memref_slice %arg2[%165, %c0_i32_71] : memref<64x32xf32, #tpu.memory_space<any>> -> memref<1x32xf32, #tpu.memory_space<any>>
    %167 = tpu.memref_squeeze %166 : memref<1x32xf32, #tpu.memory_space<any>> -> memref<32xf32, #tpu.memory_space<any>>
    %c0_i32_72 = arith.constant 0 : i32
    %168 = tpu.memref_slice %arg3[%160, %c0_i32_72] : memref<16x32xf32, #tpu.memory_space<vmem>> -> memref<1x32xf32, #tpu.memory_space<vmem>>
    %169 = tpu.memref_squeeze %168 : memref<1x32xf32, #tpu.memory_space<vmem>> -> memref<32xf32, #tpu.memory_space<vmem>>
    %170 = tpu.memref_slice %arg4[%c0_i32_70] : memref<1x!tpu.dma_semaphore, #tpu.memory_space<semaphore_mem>> -> memref<1x!tpu.dma_semaphore, #tpu.memory_space<semaphore_mem>>
    %171 = tpu.memref_squeeze %170 : memref<1x!tpu.dma_semaphore, #tpu.memory_space<semaphore_mem>> -> memref<!tpu.dma_semaphore, #tpu.memory_space<semaphore_mem>>
    tpu.enqueue_dma source(%167 : memref<32xf32, #tpu.memory_space<any>>) target(%169 : memref<32xf32, #tpu.memory_space<vmem>>) target_semaphore(%171 : memref<!tpu.dma_semaphore, #tpu.memory_space<semaphore_mem>>)
    %c14_i32 = arith.constant 14 : i32
    %172 = arith.addi %3, %c14_i32 : i32
    %173 = arith.addi %0, %172 : i32
    %174 = arith.index_cast %173 : i32 to index
    %175 = memref.load %arg1[%174] : memref<16xi32, #tpu.memory_space<smem>>
    %c0_i32_73 = arith.constant 0 : i32
    %176 = arith.maxsi %175, %c0_i32_73 : i32
    %c63_i32_74 = arith.constant 63 : i32
    %177 = arith.minsi %176, %c63_i32_74 : i32
    %c0_i32_75 = arith.constant 0 : i32
    %c0_i32_76 = arith.constant 0 : i32
    %178 = tpu.memref_slice %arg2[%177, %c0_i32_76] : memref<64x32xf32, #tpu.memory_space<any>> -> memref<1x32xf32, #tpu.memory_space<any>>
    %179 = tpu.memref_squeeze %178 : memref<1x32xf32, #tpu.memory_space<any>> -> memref<32xf32, #tpu.memory_space<any>>
    %c0_i32_77 = arith.constant 0 : i32
    %180 = tpu.memref_slice %arg3[%172, %c0_i32_77] : memref<16x32xf32, #tpu.memory_space<vmem>> -> memref<1x32xf32, #tpu.memory_space<vmem>>
    %181 = tpu.memref_squeeze %180 : memref<1x32xf32, #tpu.memory_space<vmem>> -> memref<32xf32, #tpu.memory_space<vmem>>
    %182 = tpu.memref_slice %arg4[%c0_i32_75] : memref<1x!tpu.dma_semaphore, #tpu.memory_space<semaphore_mem>> -> memref<1x!tpu.dma_semaphore, #tpu.memory_space<semaphore_mem>>
    %183 = tpu.memref_squeeze %182 : memref<1x!tpu.dma_semaphore, #tpu.memory_space<semaphore_mem>> -> memref<!tpu.dma_semaphore, #tpu.memory_space<semaphore_mem>>
    tpu.enqueue_dma source(%179 : memref<32xf32, #tpu.memory_space<any>>) target(%181 : memref<32xf32, #tpu.memory_space<vmem>>) target_semaphore(%183 : memref<!tpu.dma_semaphore, #tpu.memory_space<semaphore_mem>>)
    %c15_i32 = arith.constant 15 : i32
    %184 = arith.addi %3, %c15_i32 : i32
    %185 = arith.addi %0, %184 : i32
    %186 = arith.index_cast %185 : i32 to index
    %187 = memref.load %arg1[%186] : memref<16xi32, #tpu.memory_space<smem>>
    %c0_i32_78 = arith.constant 0 : i32
    %188 = arith.maxsi %187, %c0_i32_78 : i32
    %c63_i32_79 = arith.constant 63 : i32
    %189 = arith.minsi %188, %c63_i32_79 : i32
    %c0_i32_80 = arith.constant 0 : i32
    %c0_i32_81 = arith.constant 0 : i32
    %190 = tpu.memref_slice %arg2[%189, %c0_i32_81] : memref<64x32xf32, #tpu.memory_space<any>> -> memref<1x32xf32, #tpu.memory_space<any>>
    %191 = tpu.memref_squeeze %190 : memref<1x32xf32, #tpu.memory_space<any>> -> memref<32xf32, #tpu.memory_space<any>>
    %c0_i32_82 = arith.constant 0 : i32
    %192 = tpu.memref_slice %arg3[%184, %c0_i32_82] : memref<16x32xf32, #tpu.memory_space<vmem>> -> memref<1x32xf32, #tpu.memory_space<vmem>>
    %193 = tpu.memref_squeeze %192 : memref<1x32xf32, #tpu.memory_space<vmem>> -> memref<32xf32, #tpu.memory_space<vmem>>
    %194 = tpu.memref_slice %arg4[%c0_i32_80] : memref<1x!tpu.dma_semaphore, #tpu.memory_space<semaphore_mem>> -> memref<1x!tpu.dma_semaphore, #tpu.memory_space<semaphore_mem>>
    %195 = tpu.memref_squeeze %194 : memref<1x!tpu.dma_semaphore, #tpu.memory_space<semaphore_mem>> -> memref<!tpu.dma_semaphore, #tpu.memory_space<semaphore_mem>>
    tpu.enqueue_dma source(%191 : memref<32xf32, #tpu.memory_space<any>>) target(%193 : memref<32xf32, #tpu.memory_space<vmem>>) target_semaphore(%195 : memref<!tpu.dma_semaphore, #tpu.memory_space<semaphore_mem>>)
    %c1_i32_83 = arith.constant 1 : i32
    %c0_i32_84 = arith.constant 0 : i32
    %196 = tpu.memref_slice %arg4[%c0_i32_84] : memref<1x!tpu.dma_semaphore, #tpu.memory_space<semaphore_mem>> -> memref<1x!tpu.dma_semaphore, #tpu.memory_space<semaphore_mem>>
    %197 = tpu.memref_squeeze %196 : memref<1x!tpu.dma_semaphore, #tpu.memory_space<semaphore_mem>> -> memref<!tpu.dma_semaphore, #tpu.memory_space<semaphore_mem>>
    tpu.wait_dma2 semaphore(%197 : memref<!tpu.dma_semaphore, #tpu.memory_space<semaphore_mem>>) src(%arg3 : memref<16x32xf32, #tpu.memory_space<vmem>>) dst(%arg3 : memref<16x32xf32, #tpu.memory_space<vmem>>)
    %c0 = arith.constant 0 : index
    %c0_85 = arith.constant 0 : index
    %198 = vector.load %arg3[%c0, %c0_85] : memref<16x32xf32, #tpu.memory_space<vmem>>, vector<16x32xf32>
    %cst = arith.constant 5.65685415 : f32
    %199 = vector.broadcast %cst : f32 to vector<16x32xf32>
    %200 = arith.mulf %198, %199 : vector<16x32xf32>
    %c0_86 = arith.constant 0 : index
    %c0_87 = arith.constant 0 : index
    %201 = vector.load %arg3[%c0_86, %c0_87] : memref<16x32xf32, #tpu.memory_space<vmem>>, vector<16x32xf32>
    tpu.vector_store %arg3[%c0_86, %c0_87], %200 {strides = array<i32>} : memref<16x32xf32, #tpu.memory_space<vmem>>, vector<16x32xf32>,
    return
  }
  func.func @transform_1(%arg0: i32, %arg1: memref<16xi32, #tpu.memory_space<smem>>) -> (i32, i32) {
    %c0_i32 = arith.constant 0 : i32
    %c0_i32_0 = arith.constant 0 : i32
    return %arg0, %c0_i32 : i32, i32
  }
}

</mosaic_0001>

<bundles_post_ra>
// kernel: tpu_custom_call.1
= control target key start
LH: loop header
LB: loop body
LE: loop exit
PB: predicated region body
PF: predicated region fallthrough
CT: control target
= control target key end

     0   :  { %s1322_s0 = inlined_call_operand.vmem [shape: s32[16], index: 0, kind: input, shape index: {}]   ;;  %s1323_s1 = inlined_call_operand.vmem [shape: f32[64,32], index: 1, kind: input, shape index: {}]   ;;  %s1324_s2 = inlined_call_operand.hbm [shape: f32[16,32], index: 2, kind: output, shape index: {}]  }
   0x1   :  { %s7_s11 = sshll.u32 %s1322_s0, 4  ;;  %s8_s11 = int_to_ptr.vmem [resolvable:$true] %s7_s11 }
   0x2   :  { %s1200_s12 = scalar_lea.vmem %s8_s11, 16  ;;  %p1205_p1 = scmp.lt.s32.totalorder %s8_s11, %s8_s11 }
   0x3   :  { %p1201_p0 = scmp.ne.s32.totalorder %s8_s11, %s1200_s12  ;;  %p1206_p2 = scmp.lt.s32.totalorder %s1200_s12, %s1200_s12 }
   0x5   :  { %p1207_p3 = por %p1206_p2, %p1205_p1 }
   0x7   :  { %p1208_p4 = pnand %p1207_p3, %p1201_p0 }
   0x9   :  { %1211 = shalt.err (!%p1208_p4)  }
   0xa   :  { %s1240_s13 = smov [#allocation4]  }
   0xb   :  { %10 = dma.vmem_to_smem %s8_s11, 16, %s1240_s13, [#allocation3] }
   0xc   :  { %1234 = dma.done.wait [#allocation3], 16 }
   0xd   :  { %1235 = vsyncadd [#allocation3], 4294967280 }
   0xe   :  { %12 = sfence }
   0xf   :  { %13 = vsyncpa [#allocation6], 0  ;;  %s15_s14 = sld [smem:[#allocation4]] }
  0x15   :  { %p16_p5 = scmp.gt.s32.totalorder %s15_s14, 0  ;;  %p1068_p6 = scmp.lt.s32.totalorder %s15_s14, 63 }
  0x17   :  { %s1326_s14 = smov (!%p16_p5, %s15_s14), 0 }
  0x18   :  { %s1328_s14 = smov (!%p1068_p6, %s1326_s14), 63 }
  0x19   :  { %s20_s16 = scalar_lea.vmem %s1323_s1, %s1328_s14 }
  0x1a   :  { %v38_v0 = vld [vmem:[%s20_s16] sm:$0x1] }
  0x1b   :  { %39 = vst [vmem:[#allocation5] sm:$0x1] %v38_v0 }
  0x1c   :  { %64 = vsyncadd [#allocation2], 16  ;;  %s1073_s17 = sld [smem:[#allocation4 + $0x1]] }
  0x22   :  { %p67_p7 = scmp.gt.s32.totalorder %s1073_s17, 0  ;;  %p1074_p8 = scmp.lt.s32.totalorder %s1073_s17, 63 }
  0x24   :  { %s1330_s17 = smov (!%p67_p7, %s1073_s17), 0 }
  0x25   :  { %s1332_s17 = smov (!%p1074_p8, %s1330_s17), 63 }
  0x26   :  { %s71_s20 = scalar_lea.vmem %s1323_s1, %s1332_s17 }
  0x27   :  { %v90_v1 = vld [vmem:[%s71_s20] sm:$0x1] }
  0x28   :  { %91 = vst [vmem:[#allocation5 + $0x1] sm:$0x1] %v90_v1 }
  0x29   :  { %116 = vsyncadd [#allocation2], 16  ;;  %s1079_s21 = sld [smem:[#allocation4 + $0x2]] }
  0x2f   :  { %p119_p9 = scmp.gt.s32.totalorder %s1079_s21, 0  ;;  %p1080_p10 = scmp.lt.s32.totalorder %s1079_s21, 63 }
  0x31   :  { %s1334_s21 = smov (!%p119_p9, %s1079_s21), 0 }
  0x32   :  { %s1336_s21 = smov (!%p1080_p10, %s1334_s21), 63 }
  0x33   :  { %s123_s24 = scalar_lea.vmem %s1323_s1, %s1336_s21 }
  0x34   :  { %v142_v2 = vld [vmem:[%s123_s24] sm:$0x1] }
  0x35   :  { %143 = vst [vmem:[#allocation5 + $0x2] sm:$0x1] %v142_v2 }
  0x36   :  { %168 = vsyncadd [#allocation2], 16  ;;  %s1085_s25 = sld [smem:[#allocation4 + $0x3]] }
  0x3c   :  { %p171_p11 = scmp.gt.s32.totalorder %s1085_s25, 0  ;;  %p1086_p12 = scmp.lt.s32.totalorder %s1085_s25, 63 }
  0x3e   :  { %s1338_s25 = smov (!%p171_p11, %s1085_s25), 0 }
  0x3f   :  { %s1340_s25 = smov (!%p1086_p12, %s1338_s25), 63 }
  0x40   :  { %s175_s28 = scalar_lea.vmem %s1323_s1, %s1340_s25 }
  0x41   :  { %v194_v3 = vld [vmem:[%s175_s28] sm:$0x1] }
  0x42   :  { %195 = vst [vmem:[#allocation5 + $0x3] sm:$0x1] %v194_v3 }
  0x43   :  { %220 = vsyncadd [#allocation2], 16  ;;  %s1091_s29 = sld [smem:[#allocation4 + $0x4]] }
  0x49   :  { %p223_p13 = scmp.gt.s32.totalorder %s1091_s29, 0  ;;  %p1092_p0 = scmp.lt.s32.totalorder %s1091_s29, 63 }
  0x4b   :  { %s1342_s29 = smov (!%p223_p13, %s1091_s29), 0 }
  0x4c   :  { %s1344_s29 = smov (!%p1092_p0, %s1342_s29), 63 }
  0x4d   :  { %s227_s4 = scalar_lea.vmem %s1323_s1, %s1344_s29 }
  0x4e   :  { %v246_v4 = vld [vmem:[%s227_s4] sm:$0x1] }
  0x4f   :  { %247 = vst [vmem:[#allocation5 + $0x4] sm:$0x1] %v246_v4 }
  0x50   :  { %272 = vsyncadd [#allocation2], 16  ;;  %s1097_s5 = sld [smem:[#allocation4 + $0x5]] }
  0x56   :  { %p275_p1 = scmp.gt.s32.totalorder %s1097_s5, 0  ;;  %p1098_p2 = scmp.lt.s32.totalorder %s1097_s5, 63 }
  0x58   :  { %s1346_s5 = smov (!%p275_p1, %s1097_s5), 0 }
  0x59   :  { %s1348_s5 = smov (!%p1098_p2, %s1346_s5), 63 }
  0x5a   :  { %s279_s8 = scalar_lea.vmem %s1323_s1, %s1348_s5 }
  0x5b   :  { %v298_v5 = vld [vmem:[%s279_s8] sm:$0x1] }
  0x5c   :  { %299 = vst [vmem:[#allocation5 + $0x5] sm:$0x1] %v298_v5 }
  0x5d   :  { %324 = vsyncadd [#allocation2], 16  ;;  %s1103_s9 = sld [smem:[#allocation4 + $0x6]] }
  0x63   :  { %p327_p3 = scmp.gt.s32.totalorder %s1103_s9, 0  ;;  %p1104_p4 = scmp.lt.s32.totalorder %s1103_s9, 63 }
  0x65   :  { %s1350_s9 = smov (!%p327_p3, %s1103_s9), 0 }
  0x66   :  { %s1352_s9 = smov (!%p1104_p4, %s1350_s9), 63 }
  0x67   :  { %s331_s12 = scalar_lea.vmem %s1323_s1, %s1352_s9 }
  0x68   :  { %v350_v6 = vld [vmem:[%s331_s12] sm:$0x1] }
  0x69   :  { %351 = vst [vmem:[#allocation5 + $0x6] sm:$0x1] %v350_v6 }
  0x6a   :  { %376 = vsyncadd [#allocation2], 16  ;;  %s1109_s13 = sld [smem:[#allocation4 + $0x7]] }
  0x70   :  { %p379_p5 = scmp.gt.s32.totalorder %s1109_s13, 0  ;;  %p1110_p6 = scmp.lt.s32.totalorder %s1109_s13, 63 }
  0x72   :  { %s1354_s13 = smov (!%p379_p5, %s1109_s13), 0 }
  0x73   :  { %s1356_s13 = smov (!%p1110_p6, %s1354_s13), 63 }
  0x74   :  { %s383_s15 = scalar_lea.vmem %s1323_s1, %s1356_s13 }
  0x75   :  { %v402_v7 = vld [vmem:[%s383_s15] sm:$0x1] }
  0x76   :  { %403 = vst [vmem:[#allocation5 + $0x7] sm:$0x1] %v402_v7 }
  0x77   :  { %428 = vsyncadd [#allocation2], 16  ;;  %s1115_s16 = sld [smem:[#allocation4 + $0x8]] }
  0x7d   :  { %p431_p7 = scmp.gt.s32.totalorder %s1115_s16, 0  ;;  %p1116_p8 = scmp.lt.s32.totalorder %s1115_s16, 63 }
  0x7f   :  { %s1358_s16 = smov (!%p431_p7, %s1115_s16), 0 }
  0x80   :  { %s1360_s16 = smov (!%p1116_p8, %s1358_s16), 63 }
  0x81   :  { %s435_s19 = scalar_lea.vmem %s1323_s1, %s1360_s16 }
  0x82   :  { %v454_v8 = vld [vmem:[%s435_s19] sm:$0x1] }
  0x83   :  { %455 = vst [vmem:[#allocation5 + $0x8] sm:$0x1] %v454_v8 }
  0x84   :  { %480 = vsyncadd [#allocation2], 16  ;;  %s1121_s20 = sld [smem:[#allocation4 + $0x9]] }
  0x8a   :  { %p483_p9 = scmp.gt.s32.totalorder %s1121_s20, 0  ;;  %p1122_p10 = scmp.lt.s32.totalorder %s1121_s20, 63 }
  0x8c   :  { %s1362_s20 = smov (!%p483_p9, %s1121_s20), 0 }
  0x8d   :  { %s1364_s20 = smov (!%p1122_p10, %s1362_s20), 63 }
  0x8e   :  { %s487_s23 = scalar_lea.vmem %s1323_s1, %s1364_s20 }
  0x8f   :  { %v506_v9 = vld [vmem:[%s487_s23] sm:$0x1] }
  0x90   :  { %507 = vst [vmem:[#allocation5 + $0x9] sm:$0x1] %v506_v9 }
  0x91   :  { %532 = vsyncadd [#allocation2], 16  ;;  %s1127_s24 = sld [smem:[#allocation4 + $0xa]] }
  0x97   :  { %p535_p11 = scmp.gt.s32.totalorder %s1127_s24, 0  ;;  %p1128_p12 = scmp.lt.s32.totalorder %s1127_s24, 63 }
  0x99   :  { %s1366_s24 = smov (!%p535_p11, %s1127_s24), 0 }
  0x9a   :  { %s1368_s24 = smov (!%p1128_p12, %s1366_s24), 63 }
  0x9b   :  { %s539_s27 = scalar_lea.vmem %s1323_s1, %s1368_s24 }
  0x9c   :  { %v558_v10 = vld [vmem:[%s539_s27] sm:$0x1] }
  0x9d   :  { %559 = vst [vmem:[#allocation5 + $0xa] sm:$0x1] %v558_v10 }
  0x9e   :  { %584 = vsyncadd [#allocation2], 16  ;;  %s1133_s28 = sld [smem:[#allocation4 + $0xb]] }
  0xa4   :  { %p587_p13 = scmp.gt.s32.totalorder %s1133_s28, 0  ;;  %p1134_p0 = scmp.lt.s32.totalorder %s1133_s28, 63 }
  0xa6   :  { %s1370_s28 = smov (!%p587_p13, %s1133_s28), 0 }
  0xa7   :  { %s1372_s28 = smov (!%p1134_p0, %s1370_s28), 63 }
  0xa8   :  { %s591_s3 = scalar_lea.vmem %s1323_s1, %s1372_s28 }
  0xa9   :  { %v610_v11 = vld [vmem:[%s591_s3] sm:$0x1] }
  0xaa   :  { %611 = vst [vmem:[#allocation5 + $0xb] sm:$0x1] %v610_v11 }
  0xab   :  { %636 = vsyncadd [#allocation2], 16  ;;  %s1139_s4 = sld [smem:[#allocation4 + $0xc]] }
  0xb1   :  { %p639_p1 = scmp.gt.s32.totalorder %s1139_s4, 0  ;;  %p1140_p2 = scmp.lt.s32.totalorder %s1139_s4, 63 }
  0xb3   :  { %s1374_s4 = smov (!%p639_p1, %s1139_s4), 0 }
  0xb4   :  { %s1376_s4 = smov (!%p1140_p2, %s1374_s4), 63 }
  0xb5   :  { %s643_s7 = scalar_lea.vmem %s1323_s1, %s1376_s4 }
  0xb6   :  { %v662_v12 = vld [vmem:[%s643_s7] sm:$0x1] }
  0xb7   :  { %663 = vst [vmem:[#allocation5 + $0xc] sm:$0x1] %v662_v12 }
  0xb8   :  { %688 = vsyncadd [#allocation2], 16  ;;  %s1145_s8 = sld [smem:[#allocation4 + $0xd]] }
  0xbe   :  { %p691_p3 = scmp.gt.s32.totalorder %s1145_s8, 0  ;;  %p1146_p4 = scmp.lt.s32.totalorder %s1145_s8, 63 }
  0xc0   :  { %s1378_s8 = smov (!%p691_p3, %s1145_s8), 0 }
  0xc1   :  { %s1380_s8 = smov (!%p1146_p4, %s1378_s8), 63 }
  0xc2   :  { %s695_s11 = scalar_lea.vmem %s1323_s1, %s1380_s8 }
  0xc3   :  { %v714_v13 = vld [vmem:[%s695_s11] sm:$0x1] }
  0xc4   :  { %715 = vst [vmem:[#allocation5 + $0xd] sm:$0x1] %v714_v13 }
  0xc5   :  { %740 = vsyncadd [#allocation2], 16  ;;  %s1151_s12 = sld [smem:[#allocation4 + $0xe]] }
  0xcb   :  { %p743_p5 = scmp.gt.s32.totalorder %s1151_s12, 0  ;;  %p1152_p6 = scmp.lt.s32.totalorder %s1151_s12, 63 }
  0xcd   :  { %s1382_s12 = smov (!%p743_p5, %s1151_s12), 0 }
  0xce   :  { %s1384_s12 = smov (!%p1152_p6, %s1382_s12), 63 }
  0xcf   :  { %s747_s0 = scalar_lea.vmem %s1323_s1, %s1384_s12 }
  0xd0   :  { %v766_v14 = vld [vmem:[%s747_s0] sm:$0x1] }
  0xd1   :  { %767 = vst [vmem:[#allocation5 + $0xe] sm:$0x1] %v766_v14 }
  0xd2   :  { %792 = vsyncadd [#allocation2], 16  ;;  %s1157_s15 = sld [smem:[#allocation4 + $0xf]] }
  0xd8   :  { %p795_p7 = scmp.gt.s32.totalorder %s1157_s15, 0  ;;  %p1158_p8 = scmp.lt.s32.totalorder %s1157_s15, 63 }
  0xda   :  { %s1386_s15 = smov (!%p795_p7, %s1157_s15), 0 }
  0xdb   :  { %s1388_s15 = smov (!%p1158_p8, %s1386_s15), 63 }
  0xdc   :  { %s799_s18 = scalar_lea.vmem %s1323_s1, %s1388_s15 }
  0xdd   :  { %v818_v15 = vld [vmem:[%s799_s18] sm:$0x1] }
  0xde   :  { %819 = vst [vmem:[#allocation5 + $0xf] sm:$0x1] %v818_v15 }
  0xdf   :  { %844 = vsyncadd [#allocation2], 16 }
  0xe0   :  { %1236 = dma.done.wait [#allocation2], 256 }
  0xe1   :  { %1237 = vsyncadd [#allocation2], 4294967040  ;;  %s1241_s19 = smov [#allocation5]   ;;  %v848_v16 = vld [vmem:[#allocation5] sm:$0xff]  ;;  %vm852_vm0 = vcmask 261120  }
  0xe2   :  { %s860_s20 = sshll.u32 %s1241_s19, 4  ;;  %v850_v18 = vmul.f32 5.656854, %v848_v16  ;;  %s861_s20 = int_to_ptr.vmem [resolvable:$true] %s860_s20 }
  0xe3   :  { %s1212_s21 = scalar_lea.vmem %s861_s20, 256  ;;  %p1217_p10 = scmp.lt.s32.totalorder %s861_s20, %s861_s20 }
  0xe4   :  { %853 = vst.msk [vmem:[#allocation5] sm:$0xff] %vm852_vm0, %v850_v18  ;;  %p1213_p9 = scmp.ne.s32.totalorder %s861_s20, %s1212_s21  ;;  %p1218_p11 = scmp.lt.s32.totalorder %s1212_s21, %s1212_s21 }
  0xe5   :  { %v849_v17 = vld [vmem:[#allocation5 + $0x8] sm:$0xff] }
  0xe6   :  { %v851_v19 = vmul.f32 5.656854, %v849_v17  ;;  %p1219_p12 = por %p1218_p11, %p1217_p10 }
  0xe8   :  { %854 = vst.msk [vmem:[#allocation5 + $0x8] sm:$0xff] %vm852_vm0, %v851_v19  ;;  %p1220_p13 = pnand %p1219_p12, %p1213_p9 }
  0xea   :  { %1223 = shalt.err (!%p1220_p13)
}
  0xeb   :  { %s1224_s23 = scalar_lea.hbm %s1324_s2, 256 }
  0xec   :  { %p1225_p0 = scmp.ne.s32.totalorder %s1324_s2, %s1224_s23  ;;  %p1228_p1 = scmp.lt.u32.totalorder %s1224_s23, %s1324_s2 }
  0xee   :  { %p1230_p2 = pnand %p1228_p1, %p1225_p0 }
  0xf0   :  { %1233 = shalt.err (!%p1230_p2)
}
  0xf1   :  { %s1242_s28 = smov 128   ;;  %s1243_s29 = smov 8  }
  0xf2   :  { %866 = dma.vmem_to_hbm [thread:$0]  %s861_s20, 256, %s1324_s2, [#allocation6], %s1242_s28, %s1242_s28, %s1243_s29  }
  0xf3   :  { %1238 = dma.done.wait [#allocation6], 256  }
  0xf4   :  { %1239 = vsyncadd [#allocation6], 4294967040 }
  0xf5   :  { %870 = vsyncpa [#allocation6], 1 }
  0xf6   :  { %871 = vsyncmov [#allocation2] }
  0xf9   :  { %s872_s4 = vpop.sfrf %871 }
  0xfa   :  { %p1163_p3 = scmp.ne.s32.totalorder %s872_s4, 0 }
  0xfc   :  { %876 = shalt.err (%p1163_p3)  }

</bundles_post_ra>
